<compile_context>
chip_gen: v6e
topology: v6e:2x2x1
jax: 0.10.0
libtpu: 0.0.40
codegen_flags: <defaults>
</compile_context>

<pallas_src>
import functools

import jax
import jax.numpy as jnp
from jax.experimental import pallas as pl
from jax.experimental.pallas import tpu as pltpu


def _mean_pool_kernel(m_ref, h_ref, o_ref, msum_ref, *, clamp_min: float):
    # m_ref:    (TB, TS)      attention mask tile (lane-dense)
    # h_ref:    (TB, TS, H)   hidden-state tile (native dtype)
    # o_ref:    (TB, H) f32   output block, resident across the S axis (accumulator)
    # msum_ref: (TB, 1) f32   VMEM scratch, token-count accumulator
    s_idx = pl.program_id(1)

    @pl.when(s_idx == 0)
    def _init():
        o_ref[...] = jnp.zeros_like(o_ref)
        msum_ref[...] = jnp.zeros_like(msum_ref)

    # Masked sum over this S tile on the MXU: per batch row a (1, TS) x (TS, H)
    # contraction in the activation's native dtype, accumulated in f32.
    m_native = m_ref[...].astype(h_ref.dtype)[:, None, :]          # (TB, 1, TS)
    partial = jnp.einsum(
        "bqs,bsh->bqh", m_native, h_ref[...],
        preferred_element_type=jnp.float32)                        # (TB, 1, H)
    o_ref[...] += partial[:, 0, :]

    # Token count for this tile (small cross-lane reduction).
    msum_ref[...] += jnp.sum(
        m_ref[...].astype(jnp.float32), axis=1, keepdims=True)     # (TB, 1)

    @pl.when(s_idx == pl.num_programs(1) - 1)
    def _finalize():
        denom = jnp.maximum(msum_ref[...], jnp.float32(clamp_min))  # (TB, 1)
        # Exact divide on a tiny (TB, H) block keeps bit-tight parity with torch.
        o_ref[...] = o_ref[...] / denom


def _pick_seq_tile(S: int, H: int, TB: int, itemsize: int,
                   budget_bytes: int = 8 * 1024 * 1024) -> int:
    """Largest TS that is a multiple of 128 (lane-dense mask), evenly divides S,
    and keeps the double-buffered hidden-state tile under `budget_bytes`
    (safe for v5e's 16 MiB / v7x's 32 MiB scoped VMEM defaults)."""
    for ts in (2048, 1024, 512, 256, 128):
        if S % ts == 0 and 2 * TB * ts * H * itemsize <= budget_bytes:
            return ts
    return S  # fall back to the full sequence (small-shape path)


def mean_pooling(last_hidden_state: jax.Array,
                 attention_mask: jax.Array,
                 clamp_min: float = 1e-9) -> jax.Array:
    """Masked mean pooling over the sequence axis (axis=1). Returns (B, H) f32."""
    B, S, H = last_hidden_state.shape
    assert attention_mask.shape == (B, S)

    # TB is the second-to-last dim of the mask/output blocks: multiple of 8, or B.
    TB = 8 if B % 8 == 0 else B
    TS = _pick_seq_tile(S, H, TB, jnp.dtype(last_hidden_state.dtype).itemsize)

    grid = (B // TB, S // TS)

    kernel = functools.partial(_mean_pool_kernel, clamp_min=clamp_min)

    out = pl.pallas_call(
        kernel,
        out_shape=jax.ShapeDtypeStruct((B, H), jnp.float32),
        grid_spec=pltpu.PrefetchScalarGridSpec(
            num_scalar_prefetch=0,
            grid=grid,
            in_specs=[
                # Lane-dense 2-D mask tile.
                pl.BlockSpec((TB, TS), lambda b, s: (b, s)),
                # Hidden-state tile; full H kept in the lane dimension.
                pl.BlockSpec((TB, TS, H), lambda b, s: (b, s, 0)),
            ],
            # Same output block across the S axis -> resident accumulator.
            out_specs=pl.BlockSpec((TB, H), lambda b, s: (b, 0)),
            scratch_shapes=[pltpu.VMEM((TB, 1), jnp.float32)],
        ),
        compiler_params=pltpu.CompilerParams(
            dimension_semantics=("parallel", "arbitrary"),
            vmem_limit_bytes=32 * 1024 * 1024,
        ),
    )(attention_mask, last_hidden_state)

    return out


def _reference(last_hidden_state, attention_mask, clamp_min=1e-9):
    m = attention_mask[..., None].astype(jnp.float32)
    x = last_hidden_state.astype(jnp.float32)
    sum_emb = jnp.sum(x * m, axis=1)
    sum_mask = jnp.maximum(jnp.sum(m, axis=1), clamp_min)
    return sum_emb / sum_mask


if __name__ == "__main__":
    B, S, H = 2, 8, 32
    key = jax.random.PRNGKey(0)
    k1, k2 = jax.random.split(key)

    last_hidden_state = jax.random.normal(k1, (B, S, H), dtype=jnp.float32)
    # 0/1 int attention mask (typical transformer mask) with some padding.
    attention_mask = (jax.random.uniform(k2, (B, S)) > 0.3).astype(jnp.int32)

    out = mean_pooling(last_hidden_state, attention_mask)
    out = jax.block_until_ready(out)

    ref = _reference(last_hidden_state, attention_mask)
    assert out.shape == (B, H)
    assert jnp.allclose(out, ref, atol=1e-5, rtol=1e-5), "mismatch vs reference"

    print("KERNEL_OK")
</pallas_src>

<mosaic_0001>
module attributes {stable_mosaic.version = 11 : i64} {
  func.func @_mean_pool_kernel(%arg0: i32, %arg1: i32, %arg2: memref<2x8xi32, #tpu.memory_space<vmem>>, %arg3: memref<2x8x32xf32, #tpu.memory_space<vmem>>, %arg4: memref<2x32xf32, #tpu.memory_space<vmem>>, %arg5: memref<2x1xf32, #tpu.memory_space<vmem>>) attributes {dimension_semantics = [#tpu.dimension_semantics<parallel>, #tpu.dimension_semantics<arbitrary>], iteration_bounds = array<i64: 1, 1>, scalar_prefetch = 0 : i64, scratch_operands = 1 : i64, tpu.core_type = #tpu.core_type<tc>, window_params = [{transform_indices = @transform_0, window_bounds = array<i64: 2, 8>}, {transform_indices = @transform_1, window_bounds = array<i64: 2, 8, 32>}, {transform_indices = @transform_2, window_bounds = array<i64: 2, 32>}]} {
    %c0_i32 = arith.constant 0 : i32
    %0 = arith.cmpi eq, %arg1, %c0_i32 : i32
    %1 = arith.extui %0 : i1 to i32
    %c0_i32_0 = arith.constant 0 : i32
    %2 = arith.cmpi ne, %1, %c0_i32_0 : i32
    scf.if %2 {
      %cst_18 = arith.constant 0.000000e+00 : f32
      %22 = vector.broadcast %cst_18 : f32 to vector<2x32xf32>
      %c0_19 = arith.constant 0 : index
      %c0_20 = arith.constant 0 : index
      %23 = vector.load %arg4[%c0_19, %c0_20] : memref<2x32xf32, #tpu.memory_space<vmem>>, vector<2x32xf32>
      tpu.vector_store %arg4[%c0_19, %c0_20], %22 {strides = array<i32>} : memref<2x32xf32, #tpu.memory_space<vmem>>, vector<2x32xf32>,
      %cst_21 = arith.constant 0.000000e+00 : f32
      %24 = vector.broadcast %cst_21 : f32 to vector<2x1xf32>
      %c0_22 = arith.constant 0 : index
      %c0_23 = arith.constant 0 : index
      %25 = vector.load %arg5[%c0_22, %c0_23] : memref<2x1xf32, #tpu.memory_space<vmem>>, vector<2x1xf32>
      tpu.vector_store %arg5[%c0_22, %c0_23], %24 {strides = array<i32>} : memref<2x1xf32, #tpu.memory_space<vmem>>, vector<2x1xf32>,
    } else {
    }
    %c0 = arith.constant 0 : index
    %c0_1 = arith.constant 0 : index
    %3 = vector.load %arg2[%c0, %c0_1] : memref<2x8xi32, #tpu.memory_space<vmem>>, vector<2x8xi32>
    %4 = arith.sitofp %3 : vector<2x8xi32> to vector<2x8xf32>
    %5 = vector.shape_cast %4 : vector<2x8xf32> to vector<2x1x8xf32>
    %c0_2 = arith.constant 0 : index
    %c0_3 = arith.constant 0 : index
    %c0_4 = arith.constant 0 : index
    %6 = vector.load %arg3[%c0_2, %c0_3, %c0_4] : memref<2x8x32xf32, #tpu.memory_space<vmem>>, vector<2x8x32xf32>
    "tpu.trace_start"() <{level = 10 : i32, message = "bqs,bsh->bqh"}> : () -> ()
    %cst = arith.constant dense<0.000000e+00> : vector<2x1x32xf32>
    %7 = tpu.matmul %5, %6, %cst {dimension_numbers = #tpu.dot_dimension_numbers<[2], [1], [1], [2], [0, 0, 0, 1, 1, 2], [0], [0]>} : vector<2x1x8xf32>, vector<2x8x32xf32>, vector<2x1x32xf32> -> vector<2x1x32xf32>
    "tpu.trace_stop"() : () -> ()
    %c0_5 = arith.constant 0 : index
    %c0_6 = arith.constant 0 : index
    %8 = vector.load %arg4[%c0_5, %c0_6] : memref<2x32xf32, #tpu.memory_space<vmem>>, vector<2x32xf32>
    %9 = vector.shape_cast %7 : vector<2x1x32xf32> to vector<2x32xf32>
    %10 = arith.addf %8, %9 : vector<2x32xf32>
    %c0_7 = arith.constant 0 : index
    %c0_8 = arith.constant 0 : index
    %11 = vector.load %arg4[%c0_7, %c0_8] : memref<2x32xf32, #tpu.memory_space<vmem>>, vector<2x32xf32>
    tpu.vector_store %arg4[%c0_7, %c0_8], %10 {strides = array<i32>} : memref<2x32xf32, #tpu.memory_space<vmem>>, vector<2x32xf32>,
    %c0_9 = arith.constant 0 : index
    %c0_10 = arith.constant 0 : index
    %12 = vector.load %arg5[%c0_9, %c0_10] : memref<2x1xf32, #tpu.memory_space<vmem>>, vector<2x1xf32>
    %c0_11 = arith.constant 0 : index
    %c0_12 = arith.constant 0 : index
    %13 = vector.load %arg2[%c0_11, %c0_12] : memref<2x8xi32, #tpu.memory_space<vmem>>, vector<2x8xi32>
    %14 = arith.sitofp %13 : vector<2x8xi32> to vector<2x8xf32>
    %cst_13 = arith.constant dense<0.000000e+00> : vector<2xf32>
    %15 = vector.multi_reduction <add>, %14, %cst_13 [1] : vector<2x8xf32> to vector<2xf32>
    %16 = vector.shape_cast %15 : vector<2xf32> to vector<2x1xf32>
    %17 = arith.addf %12, %16 : vector<2x1xf32>
    %c0_14 = arith.constant 0 : index
    %c0_15 = arith.constant 0 : index
    %18 = vector.load %arg5[%c0_14, %c0_15] : memref<2x1xf32, #tpu.memory_space<vmem>>, vector<2x1xf32>
    tpu.vector_store %arg5[%c0_14, %c0_15], %17 {strides = array<i32>} : memref<2x1xf32, #tpu.memory_space<vmem>>, vector<2x1xf32>,
    %c0_i32_16 = arith.constant 0 : i32
    %19 = arith.cmpi eq, %arg1, %c0_i32_16 : i32
    %20 = arith.extui %19 : i1 to i32
    %c0_i32_17 = arith.constant 0 : i32
    %21 = arith.cmpi ne, %20, %c0_i32_17 : i32
    scf.if %21 {
      %c0_18 = arith.constant 0 : index
      %c0_19 = arith.constant 0 : index
      %22 = vector.load %arg5[%c0_18, %c0_19] : memref<2x1xf32, #tpu.memory_space<vmem>>, vector<2x1xf32>
      %cst_20 = arith.constant 9.99999971E-10 : f32
      %23 = vector.broadcast %cst_20 : f32 to vector<2x1xf32>
      %24 = arith.maximumf %22, %23 : vector<2x1xf32>
      %c0_21 = arith.constant 0 : index
      %c0_22 = arith.constant 0 : index
      %25 = vector.load %arg4[%c0_21, %c0_22] : memref<2x32xf32, #tpu.memory_space<vmem>>, vector<2x32xf32>
      %26 = vector.broadcast %24 : vector<2x1xf32> to vector<2x32xf32>
      %27 = arith.divf %25, %26 : vector<2x32xf32>
      %c0_23 = arith.constant 0 : index
      %c0_24 = arith.constant 0 : index
      %28 = vector.load %arg4[%c0_23, %c0_24] : memref<2x32xf32, #tpu.memory_space<vmem>>, vector<2x32xf32>
      tpu.vector_store %arg4[%c0_23, %c0_24], %27 {strides = array<i32>} : memref<2x32xf32, #tpu.memory_space<vmem>>, vector<2x32xf32>,
    } else {
    }
    return
  }
  func.func @transform_0(%arg0: i32, %arg1: i32) -> (i32, i32) {
    %c0_i32 = arith.constant 0 : i32
    return %arg0, %arg1 : i32, i32
  }
  func.func @transform_1(%arg0: i32, %arg1: i32) -> (i32, i32, i32) {
    %c0_i32 = arith.constant 0 : i32
    %c0_i32_0 = arith.constant 0 : i32
    return %arg0, %arg1, %c0_i32 : i32, i32, i32
  }
  func.func @transform_2(%arg0: i32, %arg1: i32) -> (i32, i32) {
    %c0_i32 = arith.constant 0 : i32
    %c0_i32_0 = arith.constant 0 : i32
    return %arg0, %c0_i32 : i32, i32
  }
}

</mosaic_0001>

<bundles_post_ra>
// kernel: tpu_custom_call.1
= control target key start
LH: loop header
LB: loop body
LE: loop exit
PB: predicated region body
PF: predicated region fallthrough
CT: control target
= control target key end

     0   :  { %7 = vsyncpa [#allocation4], 0  ;;  %s400_s0 = inlined_call_operand.hbm [shape: s32[2,8], index: 0, kind: input, shape index: {}]   ;;  %s401_s1 = inlined_call_operand.hbm [shape: f32[2,8,32], index: 1, kind: input, shape index: {}]   ;;  %s402_s2 = inlined_call_operand.hbm [shape: f32[2,32], index: 2, kind: output, shape index: {}]  }
   0x1   :  { %8 = vsyncpa [#allocation7], 0 }
   0x2   :  { %9 = vsyncpa [#allocation5], 0  ;;  %s362_s9 = smov [#allocation3]   ;;  %s363_s11 = smov [#allocation6]  }
   0x3   :  { %s16_s10 = sshll.u32 %s362_s9, 4  ;;  %s25_s12 = sshll.u32 %s363_s11, 4  ;;  %s17_s10 = int_to_ptr.vmem [resolvable:$true] %s16_s10  ;;  %s26_s12 = int_to_ptr.vmem [resolvable:$true] %s25_s12 }
   0x4   :  { %s304_s13 = scalar_lea.vmem %s17_s10, 32  ;;  %p309_p1 = scmp.lt.s32.totalorder %s17_s10, %s17_s10 }
   0x5   :  { %p305_p0 = scmp.ne.s32.totalorder %s17_s10, %s304_s13  ;;  %p310_p2 = scmp.lt.s32.totalorder %s304_s13, %s304_s13 }
   0x7   :  { %p311_p3 = por %p310_p2, %p309_p1 }
   0x9   :  { %p312_p4 = pnand %p311_p3, %p305_p0 }
   0xb   :  { %315 = shalt.err (!%p312_p4)
}
   0xc   :  { %19 = dma.hbm_to_vmem [thread:$0]  %s400_s0, 32, %s17_s10, [#allocation4]  }
   0xd   :  { %s324_s16 = scalar_lea.vmem %s26_s12, 256  ;;  %p329_p6 = scmp.lt.s32.totalorder %s26_s12, %s26_s12 }
   0xe   :  { %p325_p5 = scmp.ne.s32.totalorder %s26_s12, %s324_s16  ;;  %p330_p7 = scmp.lt.s32.totalorder %s324_s16, %s324_s16 }
  0x10   :  { %p331_p8 = por %p330_p7, %p329_p6 }
  0x12   :  { %p332_p9 = pnand %p331_p8, %p325_p5 }
  0x14   :  { %335 = shalt.err (!%p332_p9)
}
  0x15   :  { %s364_s17 = smov 128   ;;  %s365_s18 = smov 8  }
  0x16   :  { %31 = dma.hbm_to_vmem [thread:$0]  %s401_s1, 256, %s26_s12, [#allocation7], %s364_s17, %s364_s17, %s365_s18  }
  0x17   :  { %356 = dma.done.wait [#allocation4], 32  }
  0x18   :  { %357 = vsyncadd [#allocation4], 4294967264 }
  0x19   :  { %358 = dma.done.wait [#allocation7], 256  }
  0x1a   :  { %359 = vsyncadd [#allocation7], 4294967040  ;;  %v52_v0 = vlaneseq  ;;  %v366_v1 = vmov 0.0   ;;  %vm367_vm0 = vmmov 0   ;;  %vm44_vm1 = vcmask 1024   ;;  %v72_v8 = vld [vmem:[#allocation6 + $0x8] sm:$0xff] }
  0x1b   :  { %279 = vmatprep.subr.mxu1 %v366_v1  ;;  %281 = vmatprep.mubr.msk.f32.mxu1 %vm367_vm0, %v366_v1  ;;  %v368_v2 = vmov 1966171168   ;;  %45 = vst.msk [vmem:[#allocation2] sm:$0x3] %vm44_vm1, %v366_v1  ;;  %v229_v7 = vld [vmem:[#allocation3] sm:$0x3] }
  0x1c   :  { %274 = vmatprep.subr.mxu0 %v366_v1  ;;  %v50_v3 = vunpack.c.l.s4 %v368_v2  ;;  %v53_v4 = vshrl.u32 %v52_v0, 7  ;;  %276 = vmatprep.mubr.msk.f32.mxu0 %vm367_vm0, %v366_v1  ;;  %vm231_vm2 = vcmask 58368   ;;  %v46_v9 = vld [vmem:[#allocation3] sm:$0x3]  ;;  %v230_v10 = vcvt.s32.f32 %v229_v7  ;;  %v71_v12 = vld [vmem:[#allocation6] sm:$0xff]  ;;  %s370_s0 = smov [#allocation8]  }
  0x1d   :  { %280 = vmatpush3.msra.mxu1 %v72_v8  ;;  %v47_v11 = vcvt.s32.f32 %v46_v9  ;;  %275 = vmatpush3.msra.mxu0 %v71_v12  ;;  %vm73_vm3 = vcmask 64512   ;;  %v369_v18 = vmov 0   ;;  %vm42_vm4 = vcmask 254976   ;;  %s258_s1 = sshll.u32 %s370_s0, 4  ;;  %s259_s1 = int_to_ptr.vmem [resolvable:$true] %s258_s1 }
  0x1e   :  { %v51_v5 = vunpack.c.0.s8 %v50_v3  ;;  %v232_v13 = vsel %vm231_vm2, %v230_v10, 0.0  ;;  %293 = vset.pattern.permute.xlu0 %v369_v18  ;;  %43 = vst.msk [vmem:[#allocation8] sm:$0x3] %vm42_vm4, %v366_v1  ;;  %vm222_vm5 = vcmask 1041409   ;;  %s336_s21 = scalar_lea.vmem %s259_s1, 32  ;;  %p341_p11 = scmp.lt.s32.totalorder %s259_s1, %s259_s1 }
  0x1f   :  { %233 = vadd.xlane.f32.xlu0 %v232_v13  ;;  %p337_p10 = scmp.ne.s32.totalorder %s259_s1, %s336_s21  ;;  %p342_p12 = scmp.lt.s32.totalorder %s336_s21, %s336_s21 }
  0x20   :  { %v54_v6 = vsub.s32 %v51_v5, %v53_v4 }
  0x21   :  { %p343_p13 = por %p342_p12, %p341_p11 }
  0x22   :  { %v55_v14 = vrot.slane %v47_v11, %v54_v6  ;;  %v228_v19 = vld [vmem:[#allocation2] sm:$0x3] }
  0x23   :  { %p344_p0 = pnand %p343_p13, %p337_p10 }
  0x24   :  { %v56_v15 = vcombine.high %v55_v14, %v55_v14  ;;  %v63_v16 = vrot.slane %v55_v14, %v54_v6 }
  0x25   :  { %v218_v28 = vld [vmem:[#allocation8] sm:$0x3] }
  0x26   :  { %v70_v17 = vrot.slane %v56_v15, %v54_v6  ;;  %277 = vmatmul.mubr.msk.f32.vlgmr.msra.gmra.mxu0 %vm73_vm3, %v63_v16 }
  0x28   :  { %282 = vmatmul.mubr.msk.f32.vlgmr.msra.gmra.mxu1 %vm73_vm3, %v70_v17 }
  0xa8   :  { %v234_v20 = vpop.xlane.xlu0 %233 }
  0xa9   :  { %v235_v21 = vadd.f32 %v234_v20, %v228_v19 }
  0xab   :  { %237 = vst.msk [vmem:[#allocation2] sm:$0x3] %vm44_vm1, %v235_v21 }
  0xb2   :  { %v241_v22 = vld [vmem:[#allocation2] sm:$0x3] }
  0xb3   :  { %v242_v23 = vmax.f32 %v241_v22, 1e-09 }
  0xb5   :  { %246 = vperm.xlu0 %293, %v242_v23  }
  0xe6   :  { %v142_v24 = vpop.f32.mrf.mxu0 }
  0xe8   :  { %v214_v25 = vpop.f32.mrf.mxu1  ;;  %v278_v26 = vpop.f32.mrf.mxu0 }
  0xe9   :  { %v221_v27 = vrot.slane %v214_v25, 7 }
  0xea   :  { %v283_v29 = vpop.f32.mrf.mxu1 }
  0xeb   :  { %v223_v30 = vsel %vm222_vm5, %v221_v27, %v142_v24 }
  0xec   :  { %v225_v31 = vadd.f32 %v223_v30, %v218_v28 }
  0xee   :  { %227 = vst.msk [vmem:[#allocation8] sm:$0x3] %vm42_vm4, %v225_v31 }
  0xf5   :  { %v243_v33 = vld [vmem:[#allocation8] sm:$0x3] }
 0x130   :  { %v247_v32 = vpop.permute.xlu0 %246 }
 0x131   :  { %294 = vrcp.f32 %v247_v32 }
 0x13e   :  { %v295_v34 = vpop.eup %294 }
 0x13f   :  { %v250_v35 = vmul.f32 %v295_v34, %v243_v33 }
 0x141   :  { %251 = vst.msk [vmem:[#allocation8] sm:$0x3] %vm42_vm4, %v250_v35 }
 0x142   :  { %347 = shalt.err (!%p344_p0)
}
 0x143   :  { %261 = dma.vmem_to_hbm [thread:$0]  %s259_s1, 32, %s402_s2, [#allocation5]  }
 0x144   :  { %360 = dma.done.wait [#allocation5], 32  }
 0x145   :  { %361 = vsyncadd [#allocation5], 4294967264 }
 0x146   :  { %265 = vsyncpa [#allocation4], 1 }
 0x147   :  { %266 = vsyncpa [#allocation7], 1 }
 0x148   :  { %267 = vsyncpa [#allocation5], 1 }

</bundles_post_ra>
